<compile_context>
chip_gen: v5e
topology: v5e:2x2
jax: 0.10.0
libtpu: 0.0.40
codegen_flags: <defaults>
</compile_context>

<pallas_src>
import jax
import jax.numpy as jnp
from jax.experimental import pallas as pl
from jax.experimental.pallas import tpu as pltpu


def _mlp_kernel(x_ref,
                w_in_ref, b_in_ref,
                w1_ref, b1_ref,
                w2_ref, b2_ref,
                w3_ref, b3_ref,
                w4_ref, b4_ref,
                w5_ref, b5_ref,
                w_out_ref, b_out_ref,
                o_ref):
    """Fused (Linear+ReLU)x6 -> Linear -> softmax for one batch tile.

    All matmuls run on the MXU with bf16 operands and f32 accumulation;
    intermediate activations never leave VMEM.  Elementwise math is f32.
    """
    h = x_ref[...].astype(jnp.bfloat16)

    def linear_f32(h_bf16, w_ref, b_ref):
        y = jnp.dot(h_bf16, w_ref[...], preferred_element_type=jnp.float32)
        return y + b_ref[...]          # bias is (1, out) f32 -> broadcasts over rows

    # Six hidden layers (unrolled at trace time).
    for w_ref, b_ref in ((w_in_ref, b_in_ref), (w1_ref, b1_ref),
                         (w2_ref, b2_ref), (w3_ref, b3_ref),
                         (w4_ref, b4_ref), (w5_ref, b5_ref)):
        h = jnp.maximum(linear_f32(h, w_ref, b_ref), 0.0).astype(jnp.bfloat16)

    logits = linear_f32(h, w_out_ref, b_out_ref)

    # Eval-mode softmax over the class (last) dim, matching F.softmax on 2-D input.
    m = jnp.max(logits, axis=-1, keepdims=True)
    e = jnp.exp(logits - m)
    inv = pl.reciprocal(jnp.sum(e, axis=-1, keepdims=True), approx=True)  # EUP slot
    # NOTE: C=10 < 128 lanes => masked store; if C ever grows, pad logits/output
    # to a multiple of 128 and slice outside the kernel for lane-dense stores.
    o_ref[...] = (e * inv).astype(o_ref.dtype)


def _choose_tile_b(B):
    """Fewer, fatter grid steps: fill MXU rows (128 v5e / 256 v6e,v7x)."""
    if B <= 256:
        return B                       # single grid step for small batches
    for t in (256, 128, 64, 32, 16, 8):
        if B % t == 0:
            return t
    raise ValueError(f"batch {B} must be a multiple of 8 for tiling")


def cat_forward(x, params, *, tile_b=None):
    """params: list of (W, b) with W as (in, out), b as (1, out), both f32."""
    B, X = x.shape
    C = params[-1][0].shape[1]
    if tile_b is None:
        tile_b = _choose_tile_b(B)
    assert B % tile_b == 0

    # Cast weights to bf16 (MXU operand dtype, halves resident VMEM + DMA bytes);
    # biases stay f32 for the elementwise epilogue.
    flat = []
    for w, b in params:
        flat += [w.astype(jnp.bfloat16), b.astype(jnp.float32)]

    def resident_spec(arr, single_buffer):
        # Constant index_map -> same block every grid step (weight stays resident).
        if single_buffer:
            return pl.BlockSpec(arr.shape, lambda i: (0,) * arr.ndim,
                                pipeline_mode=pl.Buffered(1))
        return pl.BlockSpec(arr.shape, lambda i, nd=arr.ndim: (0,) * nd)

    def build(single_buffer):
        in_specs = [pl.BlockSpec((tile_b, X), lambda i: (i, 0))]
        in_specs += [resident_spec(a, single_buffer) for a in flat]
        out_spec = pl.BlockSpec((tile_b, C), lambda i: (i, 0))
        return pl.pallas_call(
            _mlp_kernel,
            out_shape=jax.ShapeDtypeStruct((B, C), jnp.float32),
            grid_spec=pltpu.PrefetchScalarGridSpec(
                num_scalar_prefetch=0,
                grid=(B // tile_b,),
                in_specs=in_specs,
                out_specs=out_spec,
            ),
            # Batch axis is independent -> "parallel" (v7x: 2 TCs share tiles).
            # VMEM: toy shapes are tiny; set vmem_limit_bytes here if H/tile_b
            # ever scale toward the 32 MiB scoped default (16 MiB on v5e).
            compiler_params=pltpu.CompilerParams(
                dimension_semantics=("parallel",)),
        )

    try:
        return build(single_buffer=True)(x, *flat)
    except (TypeError, Exception):
        # Fallback if this jax/Mosaic build rejects Buffered(1) single-buffering.
        return build(single_buffer=False)(x, *flat)


def init_params(key, x_size, num_classes, multiplier=4):
    """Deterministic init of all Linear layers (same shapes as the torch module)."""
    H = x_size * multiplier
    dims = [(x_size, H), (H, H), (H, H), (H, H), (H, H), (H, H), (H, num_classes)]
    params = []
    for (din, dout) in dims:
        key, kw, kb = jax.random.split(key, 3)
        bound = 1.0 / jnp.sqrt(din)
        w = jax.random.uniform(kw, (din, dout), jnp.float32, -bound, bound)
        b = jax.random.uniform(kb, (1, dout), jnp.float32, -bound, bound)
        params.append((w, b))
    return params


def cat_forward_ref(x, params, *, matmul_dtype=jnp.float32):
    """Pure-JAX reference; matmul_dtype lets us match the kernel's bf16 operands."""
    h = x
    for (w, b) in params[:-1]:
        y = jnp.dot(h.astype(matmul_dtype), w.astype(matmul_dtype),
                    preferred_element_type=jnp.float32) + b
        h = jnp.maximum(y, 0.0)
    w, b = params[-1]
    logits = jnp.dot(h.astype(matmul_dtype), w.astype(matmul_dtype),
                     preferred_element_type=jnp.float32) + b
    return jax.nn.softmax(logits, axis=-1)


if __name__ == "__main__":
    # Small shapes consistent with the module: X_size=32 -> hidden=128, 10 classes.
    B, X_SIZE, NUM_CLASSES = 16, 32, 10

    key = jax.random.PRNGKey(0)
    kx, kp = jax.random.split(key)
    x = jax.random.normal(kx, (B, X_SIZE), jnp.float32)
    params = init_params(kp, X_SIZE, NUM_CLASSES)

    out = jax.block_until_ready(cat_forward(x, params))
    assert out.shape == (B, NUM_CLASSES)

    # Rows are probabilities (eval-mode softmax); approx reciprocal => small slack.
    assert jnp.allclose(jnp.sum(out, axis=-1), 1.0, atol=5e-3)

    # Tight check against a reference using the same bf16 MXU operand precision.
    ref_bf16 = cat_forward_ref(x, params, matmul_dtype=jnp.bfloat16)
    assert jnp.allclose(out, ref_bf16, atol=5e-3, rtol=1e-2), \
        float(jnp.max(jnp.abs(out - ref_bf16)))

    # Loose check against the full-f32 reference (bf16 operand rounding only).
    ref_f32 = cat_forward_ref(x, params, matmul_dtype=jnp.float32)
    assert jnp.allclose(out, ref_f32, atol=3e-2, rtol=3e-2)

    # NOTE: AlphaDropout layers in the torch module are defined but never used
    # in forward(); nothing to translate for them.
    print("KERNEL_OK")
</pallas_src>

<mosaic_0001>
module attributes {stable_mosaic.version = 11 : i64} {
  func.func @_mlp_kernel(%arg0: i32, %arg1: memref<16x32xf32, #tpu.memory_space<vmem>>, %arg2: memref<32x128xbf16, #tpu.memory_space<vmem>>, %arg3: memref<1x128xf32, #tpu.memory_space<vmem>>, %arg4: memref<128x128xbf16, #tpu.memory_space<vmem>>, %arg5: memref<1x128xf32, #tpu.memory_space<vmem>>, %arg6: memref<128x128xbf16, #tpu.memory_space<vmem>>, %arg7: memref<1x128xf32, #tpu.memory_space<vmem>>, %arg8: memref<128x128xbf16, #tpu.memory_space<vmem>>, %arg9: memref<1x128xf32, #tpu.memory_space<vmem>>, %arg10: memref<128x128xbf16, #tpu.memory_space<vmem>>, %arg11: memref<1x128xf32, #tpu.memory_space<vmem>>, %arg12: memref<128x128xbf16, #tpu.memory_space<vmem>>, %arg13: memref<1x128xf32, #tpu.memory_space<vmem>>, %arg14: memref<128x10xbf16, #tpu.memory_space<vmem>>, %arg15: memref<1x10xf32, #tpu.memory_space<vmem>>, %arg16: memref<16x10xf32, #tpu.memory_space<vmem>>) attributes {dimension_semantics = [#tpu.dimension_semantics<parallel>], iteration_bounds = array<i64: 1>, scalar_prefetch = 0 : i64, scratch_operands = 0 : i64, tpu.core_type = #tpu.core_type<tc>, window_params = [{transform_indices = @transform_0, window_bounds = array<i64: 16, 32>}, {pipeline_mode = #tpu.pipeline_mode<synchronous>, transform_indices = @transform_1, window_bounds = array<i64: 32, 128>}, {pipeline_mode = #tpu.pipeline_mode<synchronous>, transform_indices = @transform_2, window_bounds = array<i64: 1, 128>}, {pipeline_mode = #tpu.pipeline_mode<synchronous>, transform_indices = @transform_3, window_bounds = array<i64: 128, 128>}, {pipeline_mode = #tpu.pipeline_mode<synchronous>, transform_indices = @transform_4, window_bounds = array<i64: 1, 128>}, {pipeline_mode = #tpu.pipeline_mode<synchronous>, transform_indices = @transform_5, window_bounds = array<i64: 128, 128>}, {pipeline_mode = #tpu.pipeline_mode<synchronous>, transform_indices = @transform_6, window_bounds = array<i64: 1, 128>}, {pipeline_mode = #tpu.pipeline_mode<synchronous>, transform_indices = @transform_7, window_bounds = array<i64: 128, 128>}, {pipeline_mode = #tpu.pipeline_mode<synchronous>, transform_indices = @transform_8, window_bounds = array<i64: 1, 128>}, {pipeline_mode = #tpu.pipeline_mode<synchronous>, transform_indices = @transform_9, window_bounds = array<i64: 128, 128>}, {pipeline_mode = #tpu.pipeline_mode<synchronous>, transform_indices = @transform_10, window_bounds = array<i64: 1, 128>}, {pipeline_mode = #tpu.pipeline_mode<synchronous>, transform_indices = @transform_11, window_bounds = array<i64: 128, 128>}, {pipeline_mode = #tpu.pipeline_mode<synchronous>, transform_indices = @transform_12, window_bounds = array<i64: 1, 128>}, {pipeline_mode = #tpu.pipeline_mode<synchronous>, transform_indices = @transform_13, window_bounds = array<i64: 128, 10>}, {pipeline_mode = #tpu.pipeline_mode<synchronous>, transform_indices = @transform_14, window_bounds = array<i64: 1, 10>}, {transform_indices = @transform_15, window_bounds = array<i64: 16, 10>}]} {
    %c0 = arith.constant 0 : index
    %c0_0 = arith.constant 0 : index
    %0 = vector.load %arg1[%c0, %c0_0] : memref<16x32xf32, #tpu.memory_space<vmem>>, vector<16x32xf32>
    %1 = arith.truncf %0 : vector<16x32xf32> to vector<16x32xbf16>
    %c0_1 = arith.constant 0 : index
    %c0_2 = arith.constant 0 : index
    %2 = vector.load %arg2[%c0_1, %c0_2] : memref<32x128xbf16, #tpu.memory_space<vmem>>, vector<32x128xbf16>
    %cst = arith.constant dense<0.000000e+00> : vector<16x128xf32>
    %3 = tpu.matmul %1, %2, %cst {dimension_numbers = #tpu.dot_dimension_numbers<[1], [0], [0], [1], [0, 0, 1, 1], [], []>} : vector<16x32xbf16>, vector<32x128xbf16>, vector<16x128xf32> -> vector<16x128xf32>
    %c0_3 = arith.constant 0 : index
    %c0_4 = arith.constant 0 : index
    %4 = vector.load %arg3[%c0_3, %c0_4] : memref<1x128xf32, #tpu.memory_space<vmem>>, vector<1x128xf32>
    %5 = vector.broadcast %4 : vector<1x128xf32> to vector<16x128xf32>
    %6 = arith.addf %3, %5 : vector<16x128xf32>
    %cst_5 = arith.constant 0.000000e+00 : f32
    %7 = vector.broadcast %cst_5 : f32 to vector<16x128xf32>
    %8 = arith.maximumf %6, %7 : vector<16x128xf32>
    %9 = arith.truncf %8 : vector<16x128xf32> to vector<16x128xbf16>
    %c0_6 = arith.constant 0 : index
    %c0_7 = arith.constant 0 : index
    %10 = vector.load %arg4[%c0_6, %c0_7] : memref<128x128xbf16, #tpu.memory_space<vmem>>, vector<128x128xbf16>
    %cst_8 = arith.constant dense<0.000000e+00> : vector<16x128xf32>
    %11 = tpu.matmul %9, %10, %cst_8 {dimension_numbers = #tpu.dot_dimension_numbers<[1], [0], [0], [1], [0, 0, 1, 1], [], []>} : vector<16x128xbf16>, vector<128x128xbf16>, vector<16x128xf32> -> vector<16x128xf32>
    %c0_9 = arith.constant 0 : index
    %c0_10 = arith.constant 0 : index
    %12 = vector.load %arg5[%c0_9, %c0_10] : memref<1x128xf32, #tpu.memory_space<vmem>>, vector<1x128xf32>
    %13 = vector.broadcast %12 : vector<1x128xf32> to vector<16x128xf32>
    %14 = arith.addf %11, %13 : vector<16x128xf32>
    %cst_11 = arith.constant 0.000000e+00 : f32
    %15 = vector.broadcast %cst_11 : f32 to vector<16x128xf32>
    %16 = arith.maximumf %14, %15 : vector<16x128xf32>
    %17 = arith.truncf %16 : vector<16x128xf32> to vector<16x128xbf16>
    %c0_12 = arith.constant 0 : index
    %c0_13 = arith.constant 0 : index
    %18 = vector.load %arg6[%c0_12, %c0_13] : memref<128x128xbf16, #tpu.memory_space<vmem>>, vector<128x128xbf16>
    %cst_14 = arith.constant dense<0.000000e+00> : vector<16x128xf32>
    %19 = tpu.matmul %17, %18, %cst_14 {dimension_numbers = #tpu.dot_dimension_numbers<[1], [0], [0], [1], [0, 0, 1, 1], [], []>} : vector<16x128xbf16>, vector<128x128xbf16>, vector<16x128xf32> -> vector<16x128xf32>
    %c0_15 = arith.constant 0 : index
    %c0_16 = arith.constant 0 : index
    %20 = vector.load %arg7[%c0_15, %c0_16] : memref<1x128xf32, #tpu.memory_space<vmem>>, vector<1x128xf32>
    %21 = vector.broadcast %20 : vector<1x128xf32> to vector<16x128xf32>
    %22 = arith.addf %19, %21 : vector<16x128xf32>
    %cst_17 = arith.constant 0.000000e+00 : f32
    %23 = vector.broadcast %cst_17 : f32 to vector<16x128xf32>
    %24 = arith.maximumf %22, %23 : vector<16x128xf32>
    %25 = arith.truncf %24 : vector<16x128xf32> to vector<16x128xbf16>
    %c0_18 = arith.constant 0 : index
    %c0_19 = arith.constant 0 : index
    %26 = vector.load %arg8[%c0_18, %c0_19] : memref<128x128xbf16, #tpu.memory_space<vmem>>, vector<128x128xbf16>
    %cst_20 = arith.constant dense<0.000000e+00> : vector<16x128xf32>
    %27 = tpu.matmul %25, %26, %cst_20 {dimension_numbers = #tpu.dot_dimension_numbers<[1], [0], [0], [1], [0, 0, 1, 1], [], []>} : vector<16x128xbf16>, vector<128x128xbf16>, vector<16x128xf32> -> vector<16x128xf32>
    %c0_21 = arith.constant 0 : index
    %c0_22 = arith.constant 0 : index
    %28 = vector.load %arg9[%c0_21, %c0_22] : memref<1x128xf32, #tpu.memory_space<vmem>>, vector<1x128xf32>
    %29 = vector.broadcast %28 : vector<1x128xf32> to vector<16x128xf32>
    %30 = arith.addf %27, %29 : vector<16x128xf32>
    %cst_23 = arith.constant 0.000000e+00 : f32
    %31 = vector.broadcast %cst_23 : f32 to vector<16x128xf32>
    %32 = arith.maximumf %30, %31 : vector<16x128xf32>
    %33 = arith.truncf %32 : vector<16x128xf32> to vector<16x128xbf16>
    %c0_24 = arith.constant 0 : index
    %c0_25 = arith.constant 0 : index
    %34 = vector.load %arg10[%c0_24, %c0_25] : memref<128x128xbf16, #tpu.memory_space<vmem>>, vector<128x128xbf16>
    %cst_26 = arith.constant dense<0.000000e+00> : vector<16x128xf32>
    %35 = tpu.matmul %33, %34, %cst_26 {dimension_numbers = #tpu.dot_dimension_numbers<[1], [0], [0], [1], [0, 0, 1, 1], [], []>} : vector<16x128xbf16>, vector<128x128xbf16>, vector<16x128xf32> -> vector<16x128xf32>
    %c0_27 = arith.constant 0 : index
    %c0_28 = arith.constant 0 : index
    %36 = vector.load %arg11[%c0_27, %c0_28] : memref<1x128xf32, #tpu.memory_space<vmem>>, vector<1x128xf32>
    %37 = vector.broadcast %36 : vector<1x128xf32> to vector<16x128xf32>
    %38 = arith.addf %35, %37 : vector<16x128xf32>
    %cst_29 = arith.constant 0.000000e+00 : f32
    %39 = vector.broadcast %cst_29 : f32 to vector<16x128xf32>
    %40 = arith.maximumf %38, %39 : vector<16x128xf32>
    %41 = arith.truncf %40 : vector<16x128xf32> to vector<16x128xbf16>
    %c0_30 = arith.constant 0 : index
    %c0_31 = arith.constant 0 : index
    %42 = vector.load %arg12[%c0_30, %c0_31] : memref<128x128xbf16, #tpu.memory_space<vmem>>, vector<128x128xbf16>
    %cst_32 = arith.constant dense<0.000000e+00> : vector<16x128xf32>
    %43 = tpu.matmul %41, %42, %cst_32 {dimension_numbers = #tpu.dot_dimension_numbers<[1], [0], [0], [1], [0, 0, 1, 1], [], []>} : vector<16x128xbf16>, vector<128x128xbf16>, vector<16x128xf32> -> vector<16x128xf32>
    %c0_33 = arith.constant 0 : index
    %c0_34 = arith.constant 0 : index
    %44 = vector.load %arg13[%c0_33, %c0_34] : memref<1x128xf32, #tpu.memory_space<vmem>>, vector<1x128xf32>
    %45 = vector.broadcast %44 : vector<1x128xf32> to vector<16x128xf32>
    %46 = arith.addf %43, %45 : vector<16x128xf32>
    %cst_35 = arith.constant 0.000000e+00 : f32
    %47 = vector.broadcast %cst_35 : f32 to vector<16x128xf32>
    %48 = arith.maximumf %46, %47 : vector<16x128xf32>
    %49 = arith.truncf %48 : vector<16x128xf32> to vector<16x128xbf16>
    %c0_36 = arith.constant 0 : index
    %c0_37 = arith.constant 0 : index
    %50 = vector.load %arg14[%c0_36, %c0_37] : memref<128x10xbf16, #tpu.memory_space<vmem>>, vector<128x10xbf16>
    %cst_38 = arith.constant dense<0.000000e+00> : vector<16x10xf32>
    %51 = tpu.matmul %49, %50, %cst_38 {dimension_numbers = #tpu.dot_dimension_numbers<[1], [0], [0], [1], [0, 0, 1, 1], [], []>} : vector<16x128xbf16>, vector<128x10xbf16>, vector<16x10xf32> -> vector<16x10xf32>
    %c0_39 = arith.constant 0 : index
    %c0_40 = arith.constant 0 : index
    %52 = vector.load %arg15[%c0_39, %c0_40] : memref<1x10xf32, #tpu.memory_space<vmem>>, vector<1x10xf32>
    %53 = vector.broadcast %52 : vector<1x10xf32> to vector<16x10xf32>
    %54 = arith.addf %51, %53 : vector<16x10xf32>
    %cst_41 = arith.constant dense<0xFF800000> : vector<16xf32>
    %55 = vector.multi_reduction <maximumf>, %54, %cst_41 [1] : vector<16x10xf32> to vector<16xf32>
    %56 = vector.shape_cast %55 : vector<16xf32> to vector<16x1xf32>
    %57 = vector.broadcast %56 : vector<16x1xf32> to vector<16x10xf32>
    %58 = arith.subf %54, %57 : vector<16x10xf32>
    %59 = math.exp %58 : vector<16x10xf32>
    %cst_42 = arith.constant dense<0.000000e+00> : vector<16xf32>
    %60 = vector.multi_reduction <add>, %59, %cst_42 [1] : vector<16x10xf32> to vector<16xf32>
    %61 = vector.shape_cast %60 : vector<16xf32> to vector<16x1xf32>
    %62 = tpu.reciprocal %61 {approx = true} : vector<16x1xf32> -> vector<16x1xf32>
    %63 = vector.broadcast %62 : vector<16x1xf32> to vector<16x10xf32>
    %64 = arith.mulf %59, %63 : vector<16x10xf32>
    %c0_43 = arith.constant 0 : index
    %c0_44 = arith.constant 0 : index
    %65 = vector.load %arg16[%c0_43, %c0_44] : memref<16x10xf32, #tpu.memory_space<vmem>>, vector<16x10xf32>
    tpu.vector_store %arg16[%c0_43, %c0_44], %64 {strides = array<i32>} : memref<16x10xf32, #tpu.memory_space<vmem>>, vector<16x10xf32>,
    return
  }
  func.func @transform_0(%arg0: i32) -> (i32, i32) {
    %c0_i32 = arith.constant 0 : i32
    %c0_i32_0 = arith.constant 0 : i32
    return %arg0, %c0_i32 : i32, i32
  }
  func.func @transform_1(%arg0: i32) -> (i32, i32) {
    %c0_i32 = arith.constant 0 : i32
    %c0_i32_0 = arith.constant 0 : i32
    %c0_i32_1 = arith.constant 0 : i32
    return %c0_i32, %c0_i32_0 : i32, i32
  }
  func.func @transform_2(%arg0: i32) -> (i32, i32) {
    %c0_i32 = arith.constant 0 : i32
    %c0_i32_0 = arith.constant 0 : i32
    %c0_i32_1 = arith.constant 0 : i32
    return %c0_i32, %c0_i32_0 : i32, i32
  }
  func.func @transform_3(%arg0: i32) -> (i32, i32) {
    %c0_i32 = arith.constant 0 : i32
    %c0_i32_0 = arith.constant 0 : i32
    %c0_i32_1 = arith.constant 0 : i32
    return %c0_i32, %c0_i32_0 : i32, i32
  }
  func.func @transform_4(%arg0: i32) -> (i32, i32) {
    %c0_i32 = arith.constant 0 : i32
    %c0_i32_0 = arith.constant 0 : i32
    %c0_i32_1 = arith.constant 0 : i32
    return %c0_i32, %c0_i32_0 : i32, i32
  }
  func.func @transform_5(%arg0: i32) -> (i32, i32) {
    %c0_i32 = arith.constant 0 : i32
    %c0_i32_0 = arith.constant 0 : i32
    %c0_i32_1 = arith.constant 0 : i32
    return %c0_i32, %c0_i32_0 : i32, i32
  }
  func.func @transform_6(%arg0: i32) -> (i32, i32) {
    %c0_i32 = arith.constant 0 : i32
    %c0_i32_0 = arith.constant 0 : i32
    %c0_i32_1 = arith.constant 0 : i32
    return %c0_i32, %c0_i32_0 : i32, i32
  }
  func.func @transform_7(%arg0: i32) -> (i32, i32) {
    %c0_i32 = arith.constant 0 : i32
    %c0_i32_0 = arith.constant 0 : i32
    %c0_i32_1 = arith.constant 0 : i32
    return %c0_i32, %c0_i32_0 : i32, i32
  }
  func.func @transform_8(%arg0: i32) -> (i32, i32) {
    %c0_i32 = arith.constant 0 : i32
    %c0_i32_0 = arith.constant 0 : i32
    %c0_i32_1 = arith.constant 0 : i32
    return %c0_i32, %c0_i32_0 : i32, i32
  }
  func.func @transform_9(%arg0: i32) -> (i32, i32) {
    %c0_i32 = arith.constant 0 : i32
    %c0_i32_0 = arith.constant 0 : i32
    %c0_i32_1 = arith.constant 0 : i32
    return %c0_i32, %c0_i32_0 : i32, i32
  }
  func.func @transform_10(%arg0: i32) -> (i32, i32) {
    %c0_i32 = arith.constant 0 : i32
    %c0_i32_0 = arith.constant 0 : i32
    %c0_i32_1 = arith.constant 0 : i32
    return %c0_i32, %c0_i32_0 : i32, i32
  }
  func.func @transform_11(%arg0: i32) -> (i32, i32) {
    %c0_i32 = arith.constant 0 : i32
    %c0_i32_0 = arith.constant 0 : i32
    %c0_i32_1 = arith.constant 0 : i32
    return %c0_i32, %c0_i32_0 : i32, i32
  }
  func.func @transform_12(%arg0: i32) -> (i32, i32) {
    %c0_i32 = arith.constant 0 : i32
    %c0_i32_0 = arith.constant 0 : i32
    %c0_i32_1 = arith.constant 0 : i32
    return %c0_i32, %c0_i32_0 : i32, i32
  }
  func.func @transform_13(%arg0: i32) -> (i32, i32) {
    %c0_i32 = arith.constant 0 : i32
    %c0_i32_0 = arith.constant 0 : i32
    %c0_i32_1 = arith.constant 0 : i32
    return %c0_i32, %c0_i32_0 : i32, i32
  }
  func.func @transform_14(%arg0: i32) -> (i32, i32) {
    %c0_i32 = arith.constant 0 : i32
    %c0_i32_0 = arith.constant 0 : i32
    %c0_i32_1 = arith.constant 0 : i32
    return %c0_i32, %c0_i32_0 : i32, i32
  }
  func.func @transform_15(%arg0: i32) -> (i32, i32) {
    %c0_i32 = arith.constant 0 : i32
    %c0_i32_0 = arith.constant 0 : i32
    return %arg0, %c0_i32 : i32, i32
  }
}

module attributes {stable_mosaic.version = 11 : i64} {
  func.func @_mlp_kernel(%arg0: i32, %arg1: memref<16x32xf32, #tpu.memory_space<vmem>>, %arg2: memref<32x128xbf16, #tpu.memory_space<vmem>>, %arg3: memref<1x128xf32, #tpu.memory_space<vmem>>, %arg4: memref<128x128xbf16, #tpu.memory_space<vmem>>, %arg5: memref<1x128xf32, #tpu.memory_space<vmem>>, %arg6: memref<128x128xbf16, #tpu.memory_space<vmem>>, %arg7: memref<1x128xf32, #tpu.memory_space<vmem>>, %arg8: memref<128x128xbf16, #tpu.memory_space<vmem>>, %arg9: memref<1x128xf32, #tpu.memory_space<vmem>>, %arg10: memref<128x128xbf16, #tpu.memory_space<vmem>>, %arg11: memref<1x128xf32, #tpu.memory_space<vmem>>, %arg12: memref<128x128xbf16, #tpu.memory_space<vmem>>, %arg13: memref<1x128xf32, #tpu.memory_space<vmem>>, %arg14: memref<128x10xbf16, #tpu.memory_space<vmem>>, %arg15: memref<1x10xf32, #tpu.memory_space<vmem>>, %arg16: memref<16x10xf32, #tpu.memory_space<vmem>>) attributes {dimension_semantics = [#tpu.dimension_semantics<parallel>], iteration_bounds = array<i64: 1>, scalar_prefetch = 0 : i64, scratch_operands = 0 : i64, tpu.core_type = #tpu.core_type<tc>, window_params = [{transform_indices = @transform_0, window_bounds = array<i64: 16, 32>}, {pipeline_mode = #tpu.pipeline_mode<synchronous>, transform_indices = @transform_1, window_bounds = array<i64: 32, 128>}, {pipeline_mode = #tpu.pipeline_mode<synchronous>, transform_indices = @transform_2, window_bounds = array<i64: 1, 128>}, {pipeline_mode = #tpu.pipeline_mode<synchronous>, transform_indices = @transform_3, window_bounds = array<i64: 128, 128>}, {pipeline_mode = #tpu.pipeline_mode<synchronous>, transform_indices = @transform_4, window_bounds = array<i64: 1, 128>}, {pipeline_mode = #tpu.pipeline_mode<synchronous>, transform_indices = @transform_5, window_bounds = array<i64: 128, 128>}, {pipeline_mode = #tpu.pipeline_mode<synchronous>, transform_indices = @transform_6, window_bounds = array<i64: 1, 128>}, {pipeline_mode = #tpu.pipeline_mode<synchronous>, transform_indices = @transform_7, window_bounds = array<i64: 128, 128>}, {pipeline_mode = #tpu.pipeline_mode<synchronous>, transform_indices = @transform_8, window_bounds = array<i64: 1, 128>}, {pipeline_mode = #tpu.pipeline_mode<synchronous>, transform_indices = @transform_9, window_bounds = array<i64: 128, 128>}, {pipeline_mode = #tpu.pipeline_mode<synchronous>, transform_indices = @transform_10, window_bounds = array<i64: 1, 128>}, {pipeline_mode = #tpu.pipeline_mode<synchronous>, transform_indices = @transform_11, window_bounds = array<i64: 128, 128>}, {pipeline_mode = #tpu.pipeline_mode<synchronous>, transform_indices = @transform_12, window_bounds = array<i64: 1, 128>}, {pipeline_mode = #tpu.pipeline_mode<synchronous>, transform_indices = @transform_13, window_bounds = array<i64: 128, 10>}, {pipeline_mode = #tpu.pipeline_mode<synchronous>, transform_indices = @transform_14, window_bounds = array<i64: 1, 10>}, {transform_indices = @transform_15, window_bounds = array<i64: 16, 10>}]} {
    %c0 = arith.constant 0 : index
    %c0_0 = arith.constant 0 : index
    %0 = vector.load %arg1[%c0, %c0_0] : memref<16x32xf32, #tpu.memory_space<vmem>>, vector<16x32xf32>
    %1 = arith.truncf %0 : vector<16x32xf32> to vector<16x32xbf16>
    %c0_1 = arith.constant 0 : index
    %c0_2 = arith.constant 0 : index
    %2 = vector.load %arg2[%c0_1, %c0_2] : memref<32x128xbf16, #tpu.memory_space<vmem>>, vector<32x128xbf16>
    %cst = arith.constant dense<0.000000e+00> : vector<16x128xf32>
    %3 = tpu.matmul %1, %2, %cst {dimension_numbers = #tpu.dot_dimension_numbers<[1], [0], [0], [1], [0, 0, 1, 1], [], []>} : vector<16x32xbf16>, vector<32x128xbf16>, vector<16x128xf32> -> vector<16x128xf32>
    %c0_3 = arith.constant 0 : index
    %c0_4 = arith.constant 0 : index
    %4 = vector.load %arg3[%c0_3, %c0_4] : memref<1x128xf32, #tpu.memory_space<vmem>>, vector<1x128xf32>
    %5 = vector.broadcast %4 : vector<1x128xf32> to vector<16x128xf32>
    %6 = arith.addf %3, %5 : vector<16x128xf32>
    %cst_5 = arith.constant 0.000000e+00 : f32
    %7 = vector.broadcast %cst_5 : f32 to vector<16x128xf32>
    %8 = arith.maximumf %6, %7 : vector<16x128xf32>
    %9 = arith.truncf %8 : vector<16x128xf32> to vector<16x128xbf16>
    %c0_6 = arith.constant 0 : index
    %c0_7 = arith.constant 0 : index
    %10 = vector.load %arg4[%c0_6, %c0_7] : memref<128x128xbf16, #tpu.memory_space<vmem>>, vector<128x128xbf16>
    %cst_8 = arith.constant dense<0.000000e+00> : vector<16x128xf32>
    %11 = tpu.matmul %9, %10, %cst_8 {dimension_numbers = #tpu.dot_dimension_numbers<[1], [0], [0], [1], [0, 0, 1, 1], [], []>} : vector<16x128xbf16>, vector<128x128xbf16>, vector<16x128xf32> -> vector<16x128xf32>
    %c0_9 = arith.constant 0 : index
    %c0_10 = arith.constant 0 : index
    %12 = vector.load %arg5[%c0_9, %c0_10] : memref<1x128xf32, #tpu.memory_space<vmem>>, vector<1x128xf32>
    %13 = vector.broadcast %12 : vector<1x128xf32> to vector<16x128xf32>
    %14 = arith.addf %11, %13 : vector<16x128xf32>
    %cst_11 = arith.constant 0.000000e+00 : f32
    %15 = vector.broadcast %cst_11 : f32 to vector<16x128xf32>
    %16 = arith.maximumf %14, %15 : vector<16x128xf32>
    %17 = arith.truncf %16 : vector<16x128xf32> to vector<16x128xbf16>
    %c0_12 = arith.constant 0 : index
    %c0_13 = arith.constant 0 : index
    %18 = vector.load %arg6[%c0_12, %c0_13] : memref<128x128xbf16, #tpu.memory_space<vmem>>, vector<128x128xbf16>
    %cst_14 = arith.constant dense<0.000000e+00> : vector<16x128xf32>
    %19 = tpu.matmul %17, %18, %cst_14 {dimension_numbers = #tpu.dot_dimension_numbers<[1], [0], [0], [1], [0, 0, 1, 1], [], []>} : vector<16x128xbf16>, vector<128x128xbf16>, vector<16x128xf32> -> vector<16x128xf32>
    %c0_15 = arith.constant 0 : index
    %c0_16 = arith.constant 0 : index
    %20 = vector.load %arg7[%c0_15, %c0_16] : memref<1x128xf32, #tpu.memory_space<vmem>>, vector<1x128xf32>
    %21 = vector.broadcast %20 : vector<1x128xf32> to vector<16x128xf32>
    %22 = arith.addf %19, %21 : vector<16x128xf32>
    %cst_17 = arith.constant 0.000000e+00 : f32
    %23 = vector.broadcast %cst_17 : f32 to vector<16x128xf32>
    %24 = arith.maximumf %22, %23 : vector<16x128xf32>
    %25 = arith.truncf %24 : vector<16x128xf32> to vector<16x128xbf16>
    %c0_18 = arith.constant 0 : index
    %c0_19 = arith.constant 0 : index
    %26 = vector.load %arg8[%c0_18, %c0_19] : memref<128x128xbf16, #tpu.memory_space<vmem>>, vector<128x128xbf16>
    %cst_20 = arith.constant dense<0.000000e+00> : vector<16x128xf32>
    %27 = tpu.matmul %25, %26, %cst_20 {dimension_numbers = #tpu.dot_dimension_numbers<[1], [0], [0], [1], [0, 0, 1, 1], [], []>} : vector<16x128xbf16>, vector<128x128xbf16>, vector<16x128xf32> -> vector<16x128xf32>
    %c0_21 = arith.constant 0 : index
    %c0_22 = arith.constant 0 : index
    %28 = vector.load %arg9[%c0_21, %c0_22] : memref<1x128xf32, #tpu.memory_space<vmem>>, vector<1x128xf32>
    %29 = vector.broadcast %28 : vector<1x128xf32> to vector<16x128xf32>
    %30 = arith.addf %27, %29 : vector<16x128xf32>
    %cst_23 = arith.constant 0.000000e+00 : f32
    %31 = vector.broadcast %cst_23 : f32 to vector<16x128xf32>
    %32 = arith.maximumf %30, %31 : vector<16x128xf32>
    %33 = arith.truncf %32 : vector<16x128xf32> to vector<16x128xbf16>
    %c0_24 = arith.constant 0 : index
    %c0_25 = arith.constant 0 : index
    %34 = vector.load %arg10[%c0_24, %c0_25] : memref<128x128xbf16, #tpu.memory_space<vmem>>, vector<128x128xbf16>
    %cst_26 = arith.constant dense<0.000000e+00> : vector<16x128xf32>
    %35 = tpu.matmul %33, %34, %cst_26 {dimension_numbers = #tpu.dot_dimension_numbers<[1], [0], [0], [1], [0, 0, 1, 1], [], []>} : vector<16x128xbf16>, vector<128x128xbf16>, vector<16x128xf32> -> vector<16x128xf32>
    %c0_27 = arith.constant 0 : index
    %c0_28 = arith.constant 0 : index
    %36 = vector.load %arg11[%c0_27, %c0_28] : memref<1x128xf32, #tpu.memory_space<vmem>>, vector<1x128xf32>
    %37 = vector.broadcast %36 : vector<1x128xf32> to vector<16x128xf32>
    %38 = arith.addf %35, %37 : vector<16x128xf32>
    %cst_29 = arith.constant 0.000000e+00 : f32
    %39 = vector.broadcast %cst_29 : f32 to vector<16x128xf32>
    %40 = arith.maximumf %38, %39 : vector<16x128xf32>
    %41 = arith.truncf %40 : vector<16x128xf32> to vector<16x128xbf16>
    %c0_30 = arith.constant 0 : index
    %c0_31 = arith.constant 0 : index
    %42 = vector.load %arg12[%c0_30, %c0_31] : memref<128x128xbf16, #tpu.memory_space<vmem>>, vector<128x128xbf16>
    %cst_32 = arith.constant dense<0.000000e+00> : vector<16x128xf32>
    %43 = tpu.matmul %41, %42, %cst_32 {dimension_numbers = #tpu.dot_dimension_numbers<[1], [0], [0], [1], [0, 0, 1, 1], [], []>} : vector<16x128xbf16>, vector<128x128xbf16>, vector<16x128xf32> -> vector<16x128xf32>
    %c0_33 = arith.constant 0 : index
    %c0_34 = arith.constant 0 : index
    %44 = vector.load %arg13[%c0_33, %c0_34] : memref<1x128xf32, #tpu.memory_space<vmem>>, vector<1x128xf32>
    %45 = vector.broadcast %44 : vector<1x128xf32> to vector<16x128xf32>
    %46 = arith.addf %43, %45 : vector<16x128xf32>
    %cst_35 = arith.constant 0.000000e+00 : f32
    %47 = vector.broadcast %cst_35 : f32 to vector<16x128xf32>
    %48 = arith.maximumf %46, %47 : vector<16x128xf32>
    %49 = arith.truncf %48 : vector<16x128xf32> to vector<16x128xbf16>
    %c0_36 = arith.constant 0 : index
    %c0_37 = arith.constant 0 : index
    %50 = vector.load %arg14[%c0_36, %c0_37] : memref<128x10xbf16, #tpu.memory_space<vmem>>, vector<128x10xbf16>
    %cst_38 = arith.constant dense<0.000000e+00> : vector<16x10xf32>
    %51 = tpu.matmul %49, %50, %cst_38 {dimension_numbers = #tpu.dot_dimension_numbers<[1], [0], [0], [1], [0, 0, 1, 1], [], []>} : vector<16x128xbf16>, vector<128x10xbf16>, vector<16x10xf32> -> vector<16x10xf32>
    %c0_39 = arith.constant 0 : index
    %c0_40 = arith.constant 0 : index
    %52 = vector.load %arg15[%c0_39, %c0_40] : memref<1x10xf32, #tpu.memory_space<vmem>>, vector<1x10xf32>
    %53 = vector.broadcast %52 : vector<1x10xf32> to vector<16x10xf32>
    %54 = arith.addf %51, %53 : vector<16x10xf32>
    %cst_41 = arith.constant dense<0xFF800000> : vector<16xf32>
    %55 = vector.multi_reduction <maximumf>, %54, %cst_41 [1] : vector<16x10xf32> to vector<16xf32>
    %56 = vector.shape_cast %55 : vector<16xf32> to vector<16x1xf32>
    %57 = vector.broadcast %56 : vector<16x1xf32> to vector<16x10xf32>
    %58 = arith.subf %54, %57 : vector<16x10xf32>
    %59 = math.exp %58 : vector<16x10xf32>
    %cst_42 = arith.constant dense<0.000000e+00> : vector<16xf32>
    %60 = vector.multi_reduction <add>, %59, %cst_42 [1] : vector<16x10xf32> to vector<16xf32>
    %61 = vector.shape_cast %60 : vector<16xf32> to vector<16x1xf32>
    %62 = tpu.reciprocal %61 {approx = true} : vector<16x1xf32> -> vector<16x1xf32>
    %63 = vector.broadcast %62 : vector<16x1xf32> to vector<16x10xf32>
    %64 = arith.mulf %59, %63 : vector<16x10xf32>
    %c0_43 = arith.constant 0 : index
    %c0_44 = arith.constant 0 : index
    %65 = vector.load %arg16[%c0_43, %c0_44] : memref<16x10xf32, #tpu.memory_space<vmem>>, vector<16x10xf32>
    tpu.vector_store %arg16[%c0_43, %c0_44], %64 {strides = array<i32>} : memref<16x10xf32, #tpu.memory_space<vmem>>, vector<16x10xf32>,
    return
  }
  func.func @transform_0(%arg0: i32) -> (i32, i32) {
    %c0_i32 = arith.constant 0 : i32
    %c0_i32_0 = arith.constant 0 : i32
    return %arg0, %c0_i32 : i32, i32
  }
  func.func @transform_1(%arg0: i32) -> (i32, i32) {
    %c0_i32 = arith.constant 0 : i32
    %c0_i32_0 = arith.constant 0 : i32
    %c0_i32_1 = arith.constant 0 : i32
    return %c0_i32, %c0_i32_0 : i32, i32
  }
  func.func @transform_2(%arg0: i32) -> (i32, i32) {
    %c0_i32 = arith.constant 0 : i32
    %c0_i32_0 = arith.constant 0 : i32
    %c0_i32_1 = arith.constant 0 : i32
    return %c0_i32, %c0_i32_0 : i32, i32
  }
  func.func @transform_3(%arg0: i32) -> (i32, i32) {
    %c0_i32 = arith.constant 0 : i32
    %c0_i32_0 = arith.constant 0 : i32
    %c0_i32_1 = arith.constant 0 : i32
    return %c0_i32, %c0_i32_0 : i32, i32
  }
  func.func @transform_4(%arg0: i32) -> (i32, i32) {
    %c0_i32 = arith.constant 0 : i32
    %c0_i32_0 = arith.constant 0 : i32
    %c0_i32_1 = arith.constant 0 : i32
    return %c0_i32, %c0_i32_0 : i32, i32
  }
  func.func @transform_5(%arg0: i32) -> (i32, i32) {
    %c0_i32 = arith.constant 0 : i32
    %c0_i32_0 = arith.constant 0 : i32
    %c0_i32_1 = arith.constant 0 : i32
    return %c0_i32, %c0_i32_0 : i32, i32
  }
  func.func @transform_6(%arg0: i32) -> (i32, i32) {
    %c0_i32 = arith.constant 0 : i32
    %c0_i32_0 = arith.constant 0 : i32
    %c0_i32_1 = arith.constant 0 : i32
    return %c0_i32, %c0_i32_0 : i32, i32
  }
  func.func @transform_7(%arg0: i32) -> (i32, i32) {
    %c0_i32 = arith.constant 0 : i32
    %c0_i32_0 = arith.constant 0 : i32
    %c0_i32_1 = arith.constant 0 : i32
    return %c0_i32, %c0_i32_0 : i32, i32
  }
  func.func @transform_8(%arg0: i32) -> (i32, i32) {
    %c0_i32 = arith.constant 0 : i32
    %c0_i32_0 = arith.constant 0 : i32
    %c0_i32_1 = arith.constant 0 : i32
    return %c0_i32, %c0_i32_0 : i32, i32
  }
  func.func @transform_9(%arg0: i32) -> (i32, i32) {
    %c0_i32 = arith.constant 0 : i32
    %c0_i32_0 = arith.constant 0 : i32
    %c0_i32_1 = arith.constant 0 : i32
    return %c0_i32, %c0_i32_0 : i32, i32
  }
  func.func @transform_10(%arg0: i32) -> (i32, i32) {
    %c0_i32 = arith.constant 0 : i32
    %c0_i32_0 = arith.constant 0 : i32
    %c0_i32_1 = arith.constant 0 : i32
    return %c0_i32, %c0_i32_0 : i32, i32
  }
  func.func @transform_11(%arg0: i32) -> (i32, i32) {
    %c0_i32 = arith.constant 0 : i32
    %c0_i32_0 = arith.constant 0 : i32
    %c0_i32_1 = arith.constant 0 : i32
    return %c0_i32, %c0_i32_0 : i32, i32
  }
  func.func @transform_12(%arg0: i32) -> (i32, i32) {
    %c0_i32 = arith.constant 0 : i32
    %c0_i32_0 = arith.constant 0 : i32
    %c0_i32_1 = arith.constant 0 : i32
    return %c0_i32, %c0_i32_0 : i32, i32
  }
  func.func @transform_13(%arg0: i32) -> (i32, i32) {
    %c0_i32 = arith.constant 0 : i32
    %c0_i32_0 = arith.constant 0 : i32
    %c0_i32_1 = arith.constant 0 : i32
    return %c0_i32, %c0_i32_0 : i32, i32
  }
  func.func @transform_14(%arg0: i32) -> (i32, i32) {
    %c0_i32 = arith.constant 0 : i32
    %c0_i32_0 = arith.constant 0 : i32
    %c0_i32_1 = arith.constant 0 : i32
    return %c0_i32, %c0_i32_0 : i32, i32
  }
  func.func @transform_15(%arg0: i32) -> (i32, i32) {
    %c0_i32 = arith.constant 0 : i32
    %c0_i32_0 = arith.constant 0 : i32
    return %arg0, %c0_i32 : i32, i32
  }
}

</mosaic_0001>

<bundles_post_ra>
// kernel: tpu_custom_call.1
= control target key start
LH: loop header
LB: loop body
LE: loop exit
PB: predicated region body
PF: predicated region fallthrough
CT: control target
= control target key end

     0   :  { %20 = vsyncpa [#allocation3], 0  ;;  %s1407_s0 = inlined_call_operand.hbm [shape: f32[16,32], index: 0, kind: input, shape index: {}]   ;;  %s1408_s1 = inlined_call_operand.hbm [shape: bf16[32,128], index: 1, kind: input, shape index: {}]   ;;  %s1409_s2 = inlined_call_operand.vmem [shape: f32[1,128], index: 2, kind: input, shape index: {}]   ;;  %s1410_s3 = inlined_call_operand.vmem [shape: bf16[128,128], index: 3, kind: input, shape index: {}]   ;;  %s1411_s4 = inlined_call_operand.vmem [shape: f32[1,128], index: 4, kind: input, shape index: {}]   ;;  %s1412_s5 = inlined_call_operand.hbm [shape: bf16[128,128], index: 5, kind: input, shape index: {}]   ;;  %s1413_s6 = inlined_call_operand.vmem [shape: f32[1,128], index: 6, kind: input, shape index: {}]   ;;  %s1414_s7 = inlined_call_operand.hbm [shape: bf16[128,128], index: 7, kind: input, shape index: {}]   ;;  %s1415_s8 = inlined_call_operand.vmem [shape: f32[1,128], index: 8, kind: input, shape index: {}]   ;;  %s1416_s9 = inlined_call_operand.hbm [shape: bf16[128,128], index: 9, kind: input, shape index: {}]   ;;  %s1417_s10 = inlined_call_operand.vmem [shape: f32[1,128], index: 10, kind: input, shape index: {}]   ;;  %s1418_s11 = inlined_call_operand.hbm [shape: bf16[128,128], index: 11, kind: input, shape index: {}]   ;;  %s1419_s12 = inlined_call_operand.vmem [shape: f32[1,128], index: 12, kind: input, shape index: {}]   ;;  %s1420_s13 = inlined_call_operand.vmem [shape: bf16[128,10], index: 13, kind: input, shape index: {}]   ;;  %s1421_s14 = inlined_call_operand.vmem [shape: f32[1,10], index: 14, kind: input, shape index: {}]   ;;  %s1422_s15 = inlined_call_operand.hbm [shape: f32[16,10], index: 15, kind: output, shape index: {}]  }
   0x1   :  { %21 = vsyncpa [#allocation6], 0 }
   0x2   :  { %22 = vsyncpa [#allocation9], 0 }
   0x3   :  { %23 = vsyncpa [#allocation12], 0  ;;  %s42_s20 = sshll.u32 %s1408_s1, 4  ;;  %s43_s20 = int_to_ptr.hbm [resolvable:$true] %s42_s20 }
   0x4   :  { %24 = vsyncpa [#allocation4], 0  ;;  %s1199_s21 = smov [#allocation5]   ;;  %s76_s25 = sshll.u32 %s1414_s7, 4  ;;  %s77_s25 = int_to_ptr.hbm [resolvable:$true] %s76_s25 }
   0x5   :  { %s44_s22 = sshll.u32 %s1199_s21, 4  ;;  %s1200_s26 = smov 64   ;;  %s45_s22 = int_to_ptr.vmem [resolvable:$true] %s44_s22 }
   0x6   :  { %s1201_s27 = smov 4   ;;  %s1202_s28 = smov [#allocation8]  }
   0x7   :  { %50 = dma.hbm_to_vmem [thread:$0]  %s43_s20, 256, %s45_s22, [#allocation6], %s1200_s26, %s1200_s26, %s1201_s27  }
   0x8   :  { %s78_s29 = sshll.u32 %s1202_s28, 4  ;;  %s29_s16 = sshll.u32 %s1407_s0, 4  ;;  %s79_s29 = int_to_ptr.vmem [resolvable:$true] %s78_s29  ;;  %s30_s16 = int_to_ptr.hbm [resolvable:$true] %s29_s16 }
   0x9   :  { %84 = dma.hbm_to_vmem [thread:$0]  %s77_s25, 1024, %s79_s29, [#allocation9], %s1200_s26, %s1200_s26, %s1201_s27  }
   0xa   :  { %s1203_s7 = smov [#allocation2]   ;;  %s61_s20 = sshll.u32 %s1412_s5, 4  ;;  %s62_s20 = int_to_ptr.hbm [resolvable:$true] %s61_s20 }
   0xb   :  { %s31_s17 = sshll.u32 %s1203_s7, 4  ;;  %s1204_s21 = smov 128   ;;  %s32_s17 = int_to_ptr.vmem [resolvable:$true] %s31_s17 }
   0xc   :  { %s1205_s22 = smov 8   ;;  %s1206_s0 = smov [#allocation7]  }
   0xd   :  { %37 = dma.hbm_to_vmem [thread:$0]  %s30_s16, 256, %s32_s17, [#allocation3], %s1204_s21, %s1204_s21, %s1205_s22  }
   0xe   :  { %s63_s23 = sshll.u32 %s1206_s0, 4  ;;  %s91_s25 = sshll.u32 %s1416_s9, 4  ;;  %s64_s23 = int_to_ptr.vmem [resolvable:$true] %s63_s23  ;;  %s92_s25 = int_to_ptr.hbm [resolvable:$true] %s91_s25 }
   0xf   :  { %69 = dma.hbm_to_vmem [thread:$0]  %s62_s20, 1024, %s64_s23, [#allocation6], %s1200_s26, %s1200_s26, %s1201_s27  }
  0x10   :  { %s106_s30 = sshll.u32 %s1418_s11, 4  ;;  %s1207_s1 = smov [#allocation10]   ;;  %s107_s30 = int_to_ptr.hbm [resolvable:$true] %s106_s30 }
  0x11   :  { %s93_s7 = sshll.u32 %s1207_s1, 4  ;;  %s1208_s16 = smov [#allocation11]   ;;  %s94_s7 = int_to_ptr.vmem [resolvable:$true] %s93_s7 }
  0x12   :  { %99 = dma.hbm_to_vmem [thread:$0]  %s92_s25, 1024, %s94_s7, [#allocation9], %s1200_s26, %s1200_s26, %s1201_s27  }
  0x13   :  { %s108_s9 = sshll.u32 %s1208_s16, 4  ;;  %s109_s9 = int_to_ptr.vmem [resolvable:$true] %s108_s9 }
  0x14   :  { %114 = dma.hbm_to_vmem [thread:$0]  %s107_s30, 1024, %s109_s9, [#allocation12], %s1200_s26, %s1200_s26, %s1201_s27  }
  0x15   :  { %1189 = dma.done.wait [#allocation3], 256  }
  0x16   :  { %1190 = vsyncadd [#allocation3], 4294967040 }
  0x17   :  { %1191 = dma.done.wait [#allocation6], 1280  }
  0x18   :  { %1192 = vsyncadd [#allocation6], 4294966016 }
  0x19   :  { %1193 = dma.done.wait [#allocation9], 2048  }
  0x1a   :  { %1194 = vsyncadd [#allocation9], 4294965248 }
  0x1b   :  { %1195 = dma.done.wait [#allocation12], 1024  }
  0x1c   :  { %1196 = vsyncadd [#allocation12], 4294966272  ;;  %v946_v0 = vld [vmem:[#allocation5 + $0x8] sm:$0xff]  ;;  %v945_v1 = vld [vmem:[#allocation5] sm:$0xff]  ;;  %vm169_vm0 = vcmask 261120   ;;  %vm697_vm1 = vcmask 80896  }
  0x1d   :  { %v954_v2 = vld [vmem:[%s1410_s3 + $0x38] sm:$0xff]  ;;  %179 = vmatpush.bf16.msra.mxu0 %v946_v0  ;;  %v146_v3 = vld [vmem:[#allocation2] sm:$0xff]  ;;  %v147_v4 = vld [vmem:[#allocation2 + $0x8] sm:$0xff] }
  0x1e   :  { %258 = vmatpush.bf16.msra.mxu1 %v954_v2  ;;  %v953_v5 = vld [vmem:[%s1410_s3 + $0x30] sm:$0xff]  ;;  %v148_v6 = vpack.c.bf16 %v147_v4, %v146_v3  ;;  %v952_v7 = vld [vmem:[%s1410_s3 + $0x28] sm:$0xff]  ;;  %v951_v8 = vld [vmem:[%s1410_s3 + $0x20] sm:$0xff] }
  0x1f   :  { %v950_v9 = vld [vmem:[%s1410_s3 + $0x18] sm:$0xff]  ;;  %v949_v10 = vld [vmem:[%s1410_s3 + $0x10] sm:$0xff]  ;;  %v948_v11 = vld [vmem:[%s1410_s3 + $0x8] sm:$0xff] }
  0x20   :  { %v947_v12 = vld [vmem:[%s1410_s3] sm:$0xff]  ;;  %v962_v13 = vld [vmem:[#allocation7 + $0x38] sm:$0xff]  ;;  %v961_v14 = vld [vmem:[#allocation7 + $0x30] sm:$0xff] }
  0x21   :  { %180 = vmatpush.bf16.msra.mxu0 %v945_v1  ;;  %343 = vmatpush.bf16.msra.mxu2 %v962_v13  ;;  %v960_v15 = vld [vmem:[#allocation7 + $0x28] sm:$0xff]  ;;  %v959_v16 = vld [vmem:[#allocation7 + $0x20] sm:$0xff]  ;;  %v958_v25 = vld [vmem:[#allocation7 + $0x18] sm:$0xff] }
  0x22   :  { %259 = vmatpush.bf16.msra.mxu1 %v953_v5  ;;  %v1006_v18 = vld [vmem:[%s1409_s2] ss:$0 sm:$0xff]  ;;  %v957_v26 = vld [vmem:[#allocation7 + $0x10] sm:$0xff]  ;;  %v956_v27 = vld [vmem:[#allocation7 + $0x8] sm:$0xff] }
  0x23   :  { %v955_v28 = vld [vmem:[#allocation7] sm:$0xff]  ;;  %v970_v29 = vld [vmem:[#allocation8 + $0x38] sm:$0xff]  ;;  %v969_v30 = vld [vmem:[#allocation8 + $0x30] sm:$0xff] }
  0x24   :  { %752 = vmatmul.msk.bf16.vlgmr.msra.gmra.mxu0 %vm169_vm0, %v148_v6  ;;  %428 = vmatpush.bf16.msra.mxu3 %v970_v29  ;;  %v968_v31 = vld [vmem:[#allocation8 + $0x28] sm:$0xff]  ;;  %v967_v32 = vld [vmem:[#allocation8 + $0x20] sm:$0xff]  ;;  %v966_v41 = vld [vmem:[#allocation8 + $0x18] sm:$0xff] }
  0x25   :  { %344 = vmatpush.bf16.msra.mxu2 %v961_v14  ;;  %v1007_v34 = vld [vmem:[%s1411_s4] ss:$0 sm:$0xff]  ;;  %v965_v42 = vld [vmem:[#allocation8 + $0x10] sm:$0xff]  ;;  %v964_v43 = vld [vmem:[#allocation8 + $0x8] sm:$0xff] }
  0x26   :  { %260 = vmatpush.bf16.msra.mxu1 %v952_v7  ;;  %v963_v44 = vld [vmem:[#allocation8] sm:$0xff]  ;;  %v978_v45 = vld [vmem:[#allocation10 + $0x38] sm:$0xff]  ;;  %v977_v46 = vld [vmem:[#allocation10 + $0x30] sm:$0xff] }
  0x27   :  { %513 = vmatpush.bf16.msrb.mxu0 %v978_v45  ;;  %v976_v47 = vld [vmem:[#allocation10 + $0x28] sm:$0xff]  ;;  %v975_v48 = vld [vmem:[#allocation10 + $0x20] sm:$0xff]  ;;  %v974_v57 = vld [vmem:[#allocation10 + $0x18] sm:$0xff] }
  0x28   :  { %429 = vmatpush.bf16.msra.mxu3 %v969_v30  ;;  %v1008_v50 = vld [vmem:[%s1413_s6] ss:$0 sm:$0xff]  ;;  %v973_v58 = vld [vmem:[#allocation10 + $0x10] sm:$0xff]  ;;  %v972_v59 = vld [vmem:[#allocation10 + $0x8] sm:$0xff]  ;;  %s728_s6 = sshll.u32 %s1422_s15, 4  ;;  %s729_s6 = int_to_ptr.hbm [resolvable:$true] %s728_s6 }
  0x29   :  { %345 = vmatpush.bf16.msra.mxu2 %v960_v15  ;;  %v971_v60 = vld [vmem:[#allocation10] sm:$0xff]  ;;  %v986_v61 = vld [vmem:[#allocation11 + $0x38] sm:$0xff]  ;;  %v985_v62 = vld [vmem:[#allocation11 + $0x30] sm:$0xff] }
  0x2a   :  { %261 = vmatpush.bf16.msra.mxu1 %v951_v8  ;;  %v984_v63 = vld [vmem:[#allocation11 + $0x28] sm:$0xff]  ;;  %v983_v0 = vld [vmem:[#allocation11 + $0x20] sm:$0xff]  ;;  %v994_v13 = vld [vmem:[%s1420_s13 + $0x38] sm:$0xff] }
  0x2b   :  { %514 = vmatpush.bf16.msrb.mxu0 %v977_v46  ;;  %v1009_v2 = vld [vmem:[%s1415_s8] ss:$0 sm:$0xff]  ;;  %v993_v14 = vld [vmem:[%s1420_s13 + $0x30] sm:$0xff]  ;;  %v992_v15 = vld [vmem:[%s1420_s13 + $0x28] sm:$0xff] }
  0x2c   :  { %430 = vmatpush.bf16.msra.mxu3 %v968_v31  ;;  %v1011_v30 = vld [vmem:[%s1419_s12] ss:$0 sm:$0xff]  ;;  %s1209_s12 = smov [#allocation13]  }
  0x2d   :  { %346 = vmatpush.bf16.msra.mxu2 %v959_v16  ;;  %v991_v16 = vld [vmem:[%s1420_s13 + $0x20] sm:$0xff] }
  0x2e   :  { %262 = vmatpush.bf16.msra.mxu1 %v950_v9  ;;  %v982_v9 = vld [vmem:[#allocation11 + $0x18] sm:$0xff] }
  0x2f   :  { %515 = vmatpush.bf16.msrb.mxu0 %v976_v47 }
  0x30   :  { %431 = vmatpush.bf16.msra.mxu3 %v967_v32 }
  0x31   :  { %347 = vmatpush.bf16.msra.mxu2 %v958_v25  ;;  %v990_v25 = vld [vmem:[%s1420_s13 + $0x18] sm:$0xff] }
  0x32   :  { %263 = vmatpush.bf16.msra.mxu1 %v949_v10  ;;  %v981_v10 = vld [vmem:[#allocation11 + $0x10] sm:$0xff] }
  0x33   :  { %516 = vmatpush.bf16.msrb.mxu0 %v975_v48 }
  0x34   :  { %432 = vmatpush.bf16.msra.mxu3 %v966_v41 }
  0x35   :  { %348 = vmatpush.bf16.msra.mxu2 %v957_v26  ;;  %v989_v26 = vld [vmem:[%s1420_s13 + $0x10] sm:$0xff] }
  0x36   :  { %264 = vmatpush.bf16.msra.mxu1 %v948_v11  ;;  %v980_v11 = vld [vmem:[#allocation11 + $0x8] sm:$0xff] }
  0x37   :  { %517 = vmatpush.bf16.msrb.mxu0 %v974_v57 }
  0x38   :  { %433 = vmatpush.bf16.msra.mxu3 %v965_v42 }
  0x39   :  { %349 = vmatpush.bf16.msra.mxu2 %v956_v27  ;;  %v988_v27 = vld [vmem:[%s1420_s13 + $0x8] sm:$0xff] }
  0x3a   :  { %265 = vmatpush.bf16.msra.mxu1 %v947_v12  ;;  %v979_v12 = vld [vmem:[#allocation11] sm:$0xff] }
  0x3b   :  { %518 = vmatpush.bf16.msrb.mxu0 %v973_v58 }
  0x3c   :  { %434 = vmatpush.bf16.msra.mxu3 %v964_v43 }
  0x3d   :  { %350 = vmatpush.bf16.msra.mxu2 %v955_v28  ;;  %v987_v28 = vld [vmem:[%s1420_s13] sm:$0xff]  ;;  %s726_s13 = sshll.u32 %s1209_s12, 4  ;;  %s727_s13 = int_to_ptr.vmem [resolvable:$true] %s726_s13 }
  0x3e   :  { %598 = vmatpush.bf16.msrb.mxu1 %v986_v61 }
  0x3f   :  { %519 = vmatpush.bf16.msrb.mxu0 %v972_v59 }
  0x40   :  { %435 = vmatpush.bf16.msra.mxu3 %v963_v44 }
  0x41   :  { %683 = vmatpush.bf16.msrb.mxu2 %v994_v13 }
  0x42   :  { %599 = vmatpush.bf16.msrb.mxu1 %v985_v62 }
  0x43   :  { %520 = vmatpush.bf16.msrb.mxu0 %v971_v60 }
  0x45   :  { %684 = vmatpush.bf16.msrb.mxu2 %v993_v14 }
  0x46   :  { %600 = vmatpush.bf16.msrb.mxu1 %v984_v63 }
  0x49   :  { %685 = vmatpush.bf16.msrb.mxu2 %v992_v15 }
  0x4a   :  { %601 = vmatpush.bf16.msrb.mxu1 %v983_v0 }
  0x4d   :  { %686 = vmatpush.bf16.msrb.mxu2 %v991_v16 }
  0x4e   :  { %602 = vmatpush.bf16.msrb.mxu1 %v982_v9 }
  0x51   :  { %687 = vmatpush.bf16.msrb.mxu2 %v990_v25 }
  0x52   :  { %603 = vmatpush.bf16.msrb.mxu1 %v981_v10 }
  0x55   :  { %688 = vmatpush.bf16.msrb.mxu2 %v989_v26 }
  0x56   :  { %604 = vmatpush.bf16.msrb.mxu1 %v980_v11 }
  0x59   :  { %689 = vmatpush.bf16.msrb.mxu2 %v988_v27 }
  0x5a   :  { %605 = vmatpush.bf16.msrb.mxu1 %v979_v12 }
  0x5d   :  { %690 = vmatpush.bf16.msrb.mxu2 %v987_v28 }
  0xa1   :  { %v182_v17 = vpop.f32.mrf.mxu0 }
  0xa2   :  { %v183_v19 = vadd.f32 %v1006_v18, %v182_v17 }
  0xa4   :  { %v187_v22 = vmax.f32 %v183_v19, 0.0 }
  0xa9   :  { %v184_v20 = vpop.f32.mrf.mxu0 }
  0xaa   :  { %v185_v21 = vadd.f32 %v1006_v18, %v184_v20  ;;  %v1010_v18 = vld [vmem:[%s1417_s10] ss:$0 sm:$0xff] }
  0xac   :  { %v188_v23 = vmax.f32 %v185_v21, 0.0 }
  0xae   :  { %v189_v24 = vpack.c.bf16 %v188_v23, %v187_v22 }
  0xb0   :  { %266 = vmatmul.bf16.vlgmr.msra.gmra.mxu1 %v189_v24 }
 0x12d   :  { %v267_v33 = vpop.f32.mrf.mxu1 }
 0x12e   :  { %v268_v35 = vadd.f32 %v1007_v34, %v267_v33 }
 0x130   :  { %v272_v38 = vmax.f32 %v268_v35, 0.0 }
 0x135   :  { %v269_v36 = vpop.f32.mrf.mxu1 }
 0x136   :  { %v270_v37 = vadd.f32 %v1007_v34, %v269_v36 }
 0x138   :  { %v273_v39 = vmax.f32 %v270_v37, 0.0  ;;  %v1012_v37 = vld [vmem:[%s1421_s14] ss:$0 sm:$0xff] }
 0x13a   :  { %v274_v40 = vpack.c.bf16 %v273_v39, %v272_v38 }
 0x13c   :  { %351 = vmatmul.bf16.vlgmr.msra.gmra.mxu2 %v274_v40 }
 0x1bf   :  { %v352_v49 = vpop.f32.mrf.mxu2 }
 0x1c0   :  { %v353_v51 = vadd.f32 %v1008_v50, %v352_v49 }
 0x1c2   :  { %v357_v54 = vmax.f32 %v353_v51, 0.0 }
 0x1c7   :  { %v354_v52 = vpop.f32.mrf.mxu2 }
 0x1c8   :  { %v355_v53 = vadd.f32 %v1008_v50, %v354_v52 }
 0x1ca   :  { %v358_v55 = vmax.f32 %v355_v53, 0.0 }
 0x1cc   :  { %v359_v56 = vpack.c.bf16 %v358_v55, %v357_v54 }
 0x1ce   :  { %436 = vmatmul.bf16.vlgmr.msra.gmra.mxu3 %v359_v56 }
 0x251   :  { %v437_v1 = vpop.f32.mrf.mxu3 }
 0x252   :  { %v438_v3 = vadd.f32 %v1009_v2, %v437_v1 }
 0x254   :  { %v442_v6 = vmax.f32 %v438_v3, 0.0 }
 0x259   :  { %v439_v4 = vpop.f32.mrf.mxu3 }
 0x25a   :  { %v440_v5 = vadd.f32 %v1009_v2, %v439_v4 }
 0x25c   :  { %v443_v7 = vmax.f32 %v440_v5, 0.0 }
 0x25e   :  { %v444_v8 = vpack.c.bf16 %v443_v7, %v442_v6 }
 0x260   :  { %521 = vmatmul.bf16.vlgmr.msrb.gmra.mxu0 %v444_v8 }
 0x2dd   :  { %v522_v17 = vpop.f32.mrf.mxu0 }
 0x2de   :  { %v523_v19 = vadd.f32 %v1010_v18, %v522_v17 }
 0x2e0   :  { %v527_v22 = vmax.f32 %v523_v19, 0.0 }
 0x2e5   :  { %v524_v20 = vpop.f32.mrf.mxu0 }
 0x2e6   :  { %v525_v21 = vadd.f32 %v1010_v18, %v524_v20 }
 0x2e8   :  { %v528_v23 = vmax.f32 %v525_v21, 0.0 }
 0x2ea   :  { %v529_v24 = vpack.c.bf16 %v528_v23, %v527_v22 }
 0x2ec   :  { %606 = vmatmul.bf16.vlgmr.msrb.gmra.mxu1 %v529_v24 }
 0x369   :  { %v607_v29 = vpop.f32.mrf.mxu1 }
 0x36a   :  { %v608_v31 = vadd.f32 %v1011_v30, %v607_v29 }
 0x36c   :  { %v612_v34 = vmax.f32 %v608_v31, 0.0 }
 0x371   :  { %v609_v32 = vpop.f32.mrf.mxu1 }
 0x372   :  { %v610_v33 = vadd.f32 %v1011_v30, %v609_v32 }
 0x374   :  { %v613_v35 = vmax.f32 %v610_v33, 0.0 }
 0x376   :  { %v614_v36 = vpack.c.bf16 %v613_v35, %v612_v34 }
 0x378   :  { %691 = vmatmul.bf16.vlgmr.msrb.gmra.mxu2 %v614_v36 }
 0x3fb   :  { %v692_v38 = vpop.f32.mrf.mxu2 }
 0x3fc   :  { %v693_v39 = vadd.f32 %v1012_v37, %v692_v38 }
 0x3fe   :  { %v698_v40 = vsel %vm697_vm1, %v693_v39, -inf }
 0x3ff   :  { %699 = vmax.xlane.f32.xlu0 %v698_v40 }
 0x403   :  { %v694_v41 = vpop.f32.mrf.mxu2 }
 0x404   :  { %v695_v42 = vadd.f32 %v1012_v37, %v694_v41 }
 0x406   :  { %v701_v43 = vsel %vm697_vm1, %v695_v42, -inf }
 0x407   :  { %702 = vmax.xlane.f32.xlu0 %v701_v43 }
 0x472   :  { %v700_v44 = vpop.xlane.xlu0 %699 }
 0x473   :  { %v704_v45 = vsub.f32 %v693_v39, %v700_v44 }
 0x475   :  { %v706_v46 = vmul.f32 1.442695, %v704_v45 }
 0x477   :  { %1013 = vpow2.f32 %v706_v46 }
 0x47a   :  { %v703_v47 = vpop.xlane.xlu0 %702 }
 0x47b   :  { %v705_v48 = vsub.f32 %v695_v42, %v703_v47 }
 0x47d   :  { %v1014_v49 = vpop.eup %1013  ;;  %v708_v50 = vmul.f32 1.442695, %v705_v48 }
 0x47e   :  { %v710_v51 = vsel %vm697_vm1, %v1014_v49, 0.0 }
 0x47f   :  { %1015 = vpow2.f32 %v708_v50  ;;  %711 = vadd.xlane.f32.xlu1 %v710_v51 }
 0x485   :  { %v1016_v52 = vpop.eup %1015 }
 0x486   :  { %v713_v53 = vsel %vm697_vm1, %v1016_v52, 0.0 }
 0x487   :  { %714 = vadd.xlane.f32.xlu1 %v713_v53 }
 0x4f2   :  { %v712_v54 = vpop.xlane.xlu1 %711 }
 0x4f3   :  { %1017 = vrcp.f32 %v712_v54 }
 0x4f9   :  { %v1018_v55 = vpop.eup %1017 }
 0x4fa   :  { %v718_v56 = vmul.f32 %v1018_v55, %v1014_v49  ;;  %v715_v57 = vpop.xlane.xlu1 %714 }
 0x4fb   :  { %1019 = vrcp.f32 %v715_v57 }
 0x4fc   :  { %720 = vst.msk [vmem:[#allocation13] sm:$0xff] %vm697_vm1, %v718_v56 }
 0x501   :  { %v1020_v58 = vpop.eup %1019 }
 0x502   :  { %v719_v59 = vmul.f32 %v1020_v58, %v1016_v52 }
 0x504   :  { %721 = vst.msk [vmem:[#allocation13 + $0x8] sm:$0xff] %vm697_vm1, %v719_v59 }
 0x505   :  { %734 = dma.vmem_to_hbm [thread:$0]  %s727_s13, 256, %s729_s6, [#allocation4], %s1204_s21, %s1204_s21, %s1205_s22  }
 0x506   :  { %1197 = dma.done.wait [#allocation4], 256  }
 0x507   :  { %1198 = vsyncadd [#allocation4], 4294967040 }
 0x508   :  { %739 = vsyncpa [#allocation3], 1 }
 0x509   :  { %740 = vsyncpa [#allocation6], 1 }
 0x50a   :  { %741 = vsyncpa [#allocation9], 1 }
 0x50b   :  { %742 = vsyncpa [#allocation12], 1 }
 0x50c   :  { %743 = vsyncpa [#allocation4], 1 }

// kernel: tpu_custom_call.1
= control target key start
LH: loop header
LB: loop body
LE: loop exit
PB: predicated region body
PF: predicated region fallthrough
CT: control target
= control target key end

     0   :  { %20 = vsyncpa [#allocation3], 0  ;;  %s1407_s0 = inlined_call_operand.hbm [shape: f32[16,32], index: 0, kind: input, shape index: {}]   ;;  %s1408_s1 = inlined_call_operand.hbm [shape: bf16[32,128], index: 1, kind: input, shape index: {}]   ;;  %s1409_s2 = inlined_call_operand.vmem [shape: f32[1,128], index: 2, kind: input, shape index: {}]   ;;  %s1410_s3 = inlined_call_operand.vmem [shape: bf16[128,128], index: 3, kind: input, shape index: {}]   ;;  %s1411_s4 = inlined_call_operand.vmem [shape: f32[1,128], index: 4, kind: input, shape index: {}]   ;;  %s1412_s5 = inlined_call_operand.hbm [shape: bf16[128,128], index: 5, kind: input, shape index: {}]   ;;  %s1413_s6 = inlined_call_operand.vmem [shape: f32[1,128], index: 6, kind: input, shape index: {}]   ;;  %s1414_s7 = inlined_call_operand.hbm [shape: bf16[128,128], index: 7, kind: input, shape index: {}]   ;;  %s1415_s8 = inlined_call_operand.vmem [shape: f32[1,128], index: 8, kind: input, shape index: {}]   ;;  %s1416_s9 = inlined_call_operand.hbm [shape: bf16[128,128], index: 9, kind: input, shape index: {}]   ;;  %s1417_s10 = inlined_call_operand.vmem [shape: f32[1,128], index: 10, kind: input, shape index: {}]   ;;  %s1418_s11 = inlined_call_operand.hbm [shape: bf16[128,128], index: 11, kind: input, shape index: {}]   ;;  %s1419_s12 = inlined_call_operand.vmem [shape: f32[1,128], index: 12, kind: input, shape index: {}]   ;;  %s1420_s13 = inlined_call_operand.vmem [shape: bf16[128,10], index: 13, kind: input, shape index: {}]   ;;  %s1421_s14 = inlined_call_operand.vmem [shape: f32[1,10], index: 14, kind: input, shape index: {}]   ;;  %s1422_s15 = inlined_call_operand.hbm [shape: f32[16,10], index: 15, kind: output, shape index: {}]  }
   0x1   :  { %21 = vsyncpa [#allocation6], 0 }
   0x2   :  { %22 = vsyncpa [#allocation9], 0 }
   0x3   :  { %23 = vsyncpa [#allocation12], 0  ;;  %s42_s20 = sshll.u32 %s1408_s1, 4  ;;  %s43_s20 = int_to_ptr.hbm [resolvable:$true] %s42_s20 }
   0x4   :  { %24 = vsyncpa [#allocation4], 0  ;;  %s1199_s21 = smov [#allocation5]   ;;  %s76_s25 = sshll.u32 %s1414_s7, 4  ;;  %s77_s25 = int_to_ptr.hbm [resolvable:$true] %s76_s25 }
   0x5   :  { %s44_s22 = sshll.u32 %s1199_s21, 4  ;;  %s1200_s26 = smov 64   ;;  %s45_s22 = int_to_ptr.vmem [resolvable:$true] %s44_s22 }
   0x6   :  { %s1201_s27 = smov 4   ;;  %s1202_s28 = smov [#allocation8]  }
   0x7   :  { %50 = dma.hbm_to_vmem [thread:$0]  %s43_s20, 256, %s45_s22, [#allocation6], %s1200_s26, %s1200_s26, %s1201_s27  }
   0x8   :  { %s78_s29 = sshll.u32 %s1202_s28, 4  ;;  %s29_s16 = sshll.u32 %s1407_s0, 4  ;;  %s79_s29 = int_to_ptr.vmem [resolvable:$true] %s78_s29  ;;  %s30_s16 = int_to_ptr.hbm [resolvable:$true] %s29_s16 }
   0x9   :  { %84 = dma.hbm_to_vmem [thread:$0]  %s77_s25, 1024, %s79_s29, [#allocation9], %s1200_s26, %s1200_s26, %s1201_s27  }
   0xa   :  { %s1203_s7 = smov [#allocation2]   ;;  %s61_s20 = sshll.u32 %s1412_s5, 4  ;;  %s62_s20 = int_to_ptr.hbm [resolvable:$true] %s61_s20 }
   0xb   :  { %s31_s17 = sshll.u32 %s1203_s7, 4  ;;  %s1204_s21 = smov 128   ;;  %s32_s17 = int_to_ptr.vmem [resolvable:$true] %s31_s17 }
   0xc   :  { %s1205_s22 = smov 8   ;;  %s1206_s0 = smov [#allocation7]  }
   0xd   :  { %37 = dma.hbm_to_vmem [thread:$0]  %s30_s16, 256, %s32_s17, [#allocation3], %s1204_s21, %s1204_s21, %s1205_s22  }
   0xe   :  { %s63_s23 = sshll.u32 %s1206_s0, 4  ;;  %s91_s25 = sshll.u32 %s1416_s9, 4  ;;  %s64_s23 = int_to_ptr.vmem [resolvable:$true] %s63_s23  ;;  %s92_s25 = int_to_ptr.hbm [resolvable:$true] %s91_s25 }
   0xf   :  { %69 = dma.hbm_to_vmem [thread:$0]  %s62_s20, 1024, %s64_s23, [#allocation6], %s1200_s26, %s1200_s26, %s1201_s27  }
  0x10   :  { %s106_s30 = sshll.u32 %s1418_s11, 4  ;;  %s1207_s1 = smov [#allocation10]   ;;  %s107_s30 = int_to_ptr.hbm [resolvable:$true] %s106_s30 }
  0x11   :  { %s93_s7 = sshll.u32 %s1207_s1, 4  ;;  %s1208_s16 = smov [#allocation11]   ;;  %s94_s7 = int_to_ptr.vmem [resolvable:$true] %s93_s7 }
  0x12   :  { %99 = dma.hbm_to_vmem [thread:$0]  %s92_s25, 1024, %s94_s7, [#allocation9], %s1200_s26, %s1200_s26, %s1201_s27  }
  0x13   :  { %s108_s9 = sshll.u32 %s1208_s16, 4  ;;  %s109_s9 = int_to_ptr.vmem [resolvable:$true] %s108_s9 }
  0x14   :  { %114 = dma.hbm_to_vmem [thread:$0]  %s107_s30, 1024, %s109_s9, [#allocation12], %s1200_s26, %s1200_s26, %s1201_s27  }
  0x15   :  { %1189 = dma.done.wait [#allocation3], 256  }
  0x16   :  { %1190 = vsyncadd [#allocation3], 4294967040 }
  0x17   :  { %1191 = dma.done.wait [#allocation6], 1280  }
  0x18   :  { %1192 = vsyncadd [#allocation6], 4294966016 }
  0x19   :  { %1193 = dma.done.wait [#allocation9], 2048  }
  0x1a   :  { %1194 = vsyncadd [#allocation9], 4294965248 }
  0x1b   :  { %1195 = dma.done.wait [#allocation12], 1024  }
  0x1c   :  { %1196 = vsyncadd [#allocation12], 4294966272  ;;  %v946_v0 = vld [vmem:[#allocation5 + $0x8] sm:$0xff]  ;;  %v945_v1 = vld [vmem:[#allocation5] sm:$0xff]  ;;  %vm169_vm0 = vcmask 261120   ;;  %vm697_vm1 = vcmask 80896  }
  0x1d   :  { %v954_v2 = vld [vmem:[%s1410_s3 + $0x38] sm:$0xff]  ;;  %179 = vmatpush.bf16.msra.mxu0 %v946_v0  ;;  %v146_v3 = vld [vmem:[#allocation2] sm:$0xff]  ;;  %v147_v4 = vld [vmem:[#allocation2 + $0x8] sm:$0xff] }
  0x1e   :  { %258 = vmatpush.bf16.msra.mxu1 %v954_v2  ;;  %v953_v5 = vld [vmem:[%s1410_s3 + $0x30] sm:$0xff]  ;;  %v148_v6 = vpack.c.bf16 %v147_v4, %v146_v3  ;;  %v952_v7 = vld [vmem:[%s1410_s3 + $0x28] sm:$0xff]  ;;  %v951_v8 = vld [vmem:[%s1410_s3 + $0x20] sm:$0xff] }
  0x1f   :  { %v950_v9 = vld [vmem:[%s1410_s3 + $0x18] sm:$0xff]  ;;  %v949_v10 = vld [vmem:[%s1410_s3 + $0x10] sm:$0xff]  ;;  %v948_v11 = vld [vmem:[%s1410_s3 + $0x8] sm:$0xff] }
  0x20   :  { %v947_v12 = vld [vmem:[%s1410_s3] sm:$0xff]  ;;  %v962_v13 = vld [vmem:[#allocation7 + $0x38] sm:$0xff]  ;;  %v961_v14 = vld [vmem:[#allocation7 + $0x30] sm:$0xff] }
  0x21   :  { %180 = vmatpush.bf16.msra.mxu0 %v945_v1  ;;  %343 = vmatpush.bf16.msra.mxu2 %v962_v13  ;;  %v960_v15 = vld [vmem:[#allocation7 + $0x28] sm:$0xff]  ;;  %v959_v16 = vld [vmem:[#allocation7 + $0x20] sm:$0xff]  ;;  %v958_v25 = vld [vmem:[#allocation7 + $0x18] sm:$0xff] }
  0x22   :  { %259 = vmatpush.bf16.msra.mxu1 %v953_v5  ;;  %v1006_v18 = vld [vmem:[%s1409_s2] ss:$0 sm:$0xff]  ;;  %v957_v26 = vld [vmem:[#allocation7 + $0x10] sm:$0xff]  ;;  %v956_v27 = vld [vmem:[#allocation7 + $0x8] sm:$0xff] }
  0x23   :  { %v955_v28 = vld [vmem:[#allocation7] sm:$0xff]  ;;  %v970_v29 = vld [vmem:[#allocation8 + $0x38] sm:$0xff]  ;;  %v969_v30 = vld [vmem:[#allocation8 + $0x30] sm:$0xff] }
  0x24   :  { %752 = vmatmul.msk.bf16.vlgmr.msra.gmra.mxu0 %vm169_vm0, %v148_v6  ;;  %428 = vmatpush.bf16.msra.mxu3 %v970_v29  ;;  %v968_v31 = vld [vmem:[#allocation8 + $0x28] sm:$0xff]  ;;  %v967_v32 = vld [vmem:[#allocation8 + $0x20] sm:$0xff]  ;;  %v966_v41 = vld [vmem:[#allocation8 + $0x18] sm:$0xff] }
  0x25   :  { %344 = vmatpush.bf16.msra.mxu2 %v961_v14  ;;  %v1007_v34 = vld [vmem:[%s1411_s4] ss:$0 sm:$0xff]  ;;  %v965_v42 = vld [vmem:[#allocation8 + $0x10] sm:$0xff]  ;;  %v964_v43 = vld [vmem:[#allocation8 + $0x8] sm:$0xff] }
  0x26   :  { %260 = vmatpush.bf16.msra.mxu1 %v952_v7  ;;  %v963_v44 = vld [vmem:[#allocation8] sm:$0xff]  ;;  %v978_v45 = vld [vmem:[#allocation10 + $0x38] sm:$0xff]  ;;  %v977_v46 = vld [vmem:[#allocation10 + $0x30] sm:$0xff] }
  0x27   :  { %513 = vmatpush.bf16.msrb.mxu0 %v978_v45  ;;  %v976_v47 = vld [vmem:[#allocation10 + $0x28] sm:$0xff]  ;;  %v975_v48 = vld [vmem:[#allocation10 + $0x20] sm:$0xff]  ;;  %v974_v57 = vld [vmem:[#allocation10 + $0x18] sm:$0xff] }
  0x28   :  { %429 = vmatpush.bf16.msra.mxu3 %v969_v30  ;;  %v1008_v50 = vld [vmem:[%s1413_s6] ss:$0 sm:$0xff]  ;;  %v973_v58 = vld [vmem:[#allocation10 + $0x10] sm:$0xff]  ;;  %v972_v59 = vld [vmem:[#allocation10 + $0x8] sm:$0xff]  ;;  %s728_s6 = sshll.u32 %s1422_s15, 4  ;;  %s729_s6 = int_to_ptr.hbm [resolvable:$true] %s728_s6 }
  0x29   :  { %345 = vmatpush.bf16.msra.mxu2 %v960_v15  ;;  %v971_v60 = vld [vmem:[#allocation10] sm:$0xff]  ;;  %v986_v61 = vld [vmem:[#allocation11 + $0x38] sm:$0xff]  ;;  %v985_v62 = vld [vmem:[#allocation11 + $0x30] sm:$0xff] }
  0x2a   :  { %261 = vmatpush.bf16.msra.mxu1 %v951_v8  ;;  %v984_v63 = vld [vmem:[#allocation11 + $0x28] sm:$0xff]  ;;  %v983_v0 = vld [vmem:[#allocation11 + $0x20] sm:$0xff]  ;;  %v994_v13 = vld [vmem:[%s1420_s13 + $0x38] sm:$0xff] }
  0x2b   :  { %514 = vmatpush.bf16.msrb.mxu0 %v977_v46  ;;  %v1009_v2 = vld [vmem:[%s1415_s8] ss:$0 sm:$0xff]  ;;  %v993_v14 = vld [vmem:[%s1420_s13 + $0x30] sm:$0xff]  ;;  %v992_v15 = vld [vmem:[%s1420_s13 + $0x28] sm:$0xff] }
  0x2c   :  { %430 = vmatpush.bf16.msra.mxu3 %v968_v31  ;;  %v1011_v30 = vld [vmem:[%s1419_s12] ss:$0 sm:$0xff]  ;;  %s1209_s12 = smov [#allocation13]  }
  0x2d   :  { %346 = vmatpush.bf16.msra.mxu2 %v959_v16  ;;  %v991_v16 = vld [vmem:[%s1420_s13 + $0x20] sm:$0xff] }
  0x2e   :  { %262 = vmatpush.bf16.msra.mxu1 %v950_v9  ;;  %v982_v9 = vld [vmem:[#allocation11 + $0x18] sm:$0xff] }
  0x2f   :  { %515 = vmatpush.bf16.msrb.mxu0 %v976_v47 }
  0x30   :  { %431 = vmatpush.bf16.msra.mxu3 %v967_v32 }
  0x31   :  { %347 = vmatpush.bf16.msra.mxu2 %v958_v25  ;;  %v990_v25 = vld [vmem:[%s1420_s13 + $0x18] sm:$0xff] }
  0x32   :  { %263 = vmatpush.bf16.msra.mxu1 %v949_v10  ;;  %v981_v10 = vld [vmem:[#allocation11 + $0x10] sm:$0xff] }
  0x33   :  { %516 = vmatpush.bf16.msrb.mxu0 %v975_v48 }
  0x34   :  { %432 = vmatpush.bf16.msra.mxu3 %v966_v41 }
  0x35   :  { %348 = vmatpush.bf16.msra.mxu2 %v957_v26  ;;  %v989_v26 = vld [vmem:[%s1420_s13 + $0x10] sm:$0xff] }
  0x36   :  { %264 = vmatpush.bf16.msra.mxu1 %v948_v11  ;;  %v980_v11 = vld [vmem:[#allocation11 + $0x8] sm:$0xff] }
  0x37   :  { %517 = vmatpush.bf16.msrb.mxu0 %v974_v57 }
  0x38   :  { %433 = vmatpush.bf16.msra.mxu3 %v965_v42 }
  0x39   :  { %349 = vmatpush.bf16.msra.mxu2 %v956_v27  ;;  %v988_v27 = vld [vmem:[%s1420_s13 + $0x8] sm:$0xff] }
  0x3a   :  { %265 = vmatpush.bf16.msra.mxu1 %v947_v12  ;;  %v979_v12 = vld [vmem:[#allocation11] sm:$0xff] }
  0x3b   :  { %518 = vmatpush.bf16.msrb.mxu0 %v973_v58 }
  0x3c   :  { %434 = vmatpush.bf16.msra.mxu3 %v964_v43 }
  0x3d   :  { %350 = vmatpush.bf16.msra.mxu2 %v955_v28  ;;  %v987_v28 = vld [vmem:[%s1420_s13] sm:$0xff]  ;;  %s726_s13 = sshll.u32 %s1209_s12, 4  ;;  %s727_s13 = int_to_ptr.vmem [resolvable:$true] %s726_s13 }
  0x3e   :  { %598 = vmatpush.bf16.msrb.mxu1 %v986_v61 }
  0x3f   :  { %519 = vmatpush.bf16.msrb.mxu0 %v972_v59 }
  0x40   :  { %435 = vmatpush.bf16.msra.mxu3 %v963_v44 }
  0x41   :  { %683 = vmatpush.bf16.msrb.mxu2 %v994_v13 }
  0x42   :  { %599 = vmatpush.bf16.msrb.mxu1 %v985_v62 }
  0x43   :  { %520 = vmatpush.bf16.msrb.mxu0 %v971_v60 }
  0x45   :  { %684 = vmatpush.bf16.msrb.mxu2 %v993_v14 }
  0x46   :  { %600 = vmatpush.bf16.msrb.mxu1 %v984_v63 }
  0x49   :  { %685 = vmatpush.bf16.msrb.mxu2 %v992_v15 }
  0x4a   :  { %601 = vmatpush.bf16.msrb.mxu1 %v983_v0 }
  0x4d   :  { %686 = vmatpush.bf16.msrb.mxu2 %v991_v16 }
  0x4e   :  { %602 = vmatpush.bf16.msrb.mxu1 %v982_v9 }
  0x51   :  { %687 = vmatpush.bf16.msrb.mxu2 %v990_v25 }
  0x52   :  { %603 = vmatpush.bf16.msrb.mxu1 %v981_v10 }
  0x55   :  { %688 = vmatpush.bf16.msrb.mxu2 %v989_v26 }
  0x56   :  { %604 = vmatpush.bf16.msrb.mxu1 %v980_v11 }
  0x59   :  { %689 = vmatpush.bf16.msrb.mxu2 %v988_v27 }
  0x5a   :  { %605 = vmatpush.bf16.msrb.mxu1 %v979_v12 }
  0x5d   :  { %690 = vmatpush.bf16.msrb.mxu2 %v987_v28 }
  0xa1   :  { %v182_v17 = vpop.f32.mrf.mxu0 }
  0xa2   :  { %v183_v19 = vadd.f32 %v1006_v18, %v182_v17 }
  0xa4   :  { %v187_v22 = vmax.f32 %v183_v19, 0.0 }
  0xa9   :  { %v184_v20 = vpop.f32.mrf.mxu0 }
  0xaa   :  { %v185_v21 = vadd.f32 %v1006_v18, %v184_v20  ;;  %v1010_v18 = vld [vmem:[%s1417_s10] ss:$0 sm:$0xff] }
  0xac   :  { %v188_v23 = vmax.f32 %v185_v21, 0.0 }
  0xae   :  { %v189_v24 = vpack.c.bf16 %v188_v23, %v187_v22 }
  0xb0   :  { %266 = vmatmul.bf16.vlgmr.msra.gmra.mxu1 %v189_v24 }
 0x12d   :  { %v267_v33 = vpop.f32.mrf.mxu1 }
 0x12e   :  { %v268_v35 = vadd.f32 %v1007_v34, %v267_v33 }
 0x130   :  { %v272_v38 = vmax.f32 %v268_v35, 0.0 }
 0x135   :  { %v269_v36 = vpop.f32.mrf.mxu1 }
 0x136   :  { %v270_v37 = vadd.f32 %v1007_v34, %v269_v36 }
 0x138   :  { %v273_v39 = vmax.f32 %v270_v37, 0.0  ;;  %v1012_v37 = vld [vmem:[%s1421_s14] ss:$0 sm:$0xff] }
 0x13a   :  { %v274_v40 = vpack.c.bf16 %v273_v39, %v272_v38 }
 0x13c   :  { %351 = vmatmul.bf16.vlgmr.msra.gmra.mxu2 %v274_v40 }
 0x1bf   :  { %v352_v49 = vpop.f32.mrf.mxu2 }
 0x1c0   :  { %v353_v51 = vadd.f32 %v1008_v50, %v352_v49 }
 0x1c2   :  { %v357_v54 = vmax.f32 %v353_v51, 0.0 }
 0x1c7   :  { %v354_v52 = vpop.f32.mrf.mxu2 }
 0x1c8   :  { %v355_v53 = vadd.f32 %v1008_v50, %v354_v52 }
 0x1ca   :  { %v358_v55 = vmax.f32 %v355_v53, 0.0 }
 0x1cc   :  { %v359_v56 = vpack.c.bf16 %v358_v55, %v357_v54 }
 0x1ce   :  { %436 = vmatmul.bf16.vlgmr.msra.gmra.mxu3 %v359_v56 }
 0x251   :  { %v437_v1 = vpop.f32.mrf.mxu3 }
 0x252   :  { %v438_v3 = vadd.f32 %v1009_v2, %v437_v1 }
 0x254   :  { %v442_v6 = vmax.f32 %v438_v3, 0.0 }
 0x259   :  { %v439_v4 = vpop.f32.mrf.mxu3 }
 0x25a   :  { %v440_v5 = vadd.f32 %v1009_v2, %v439_v4 }
 0x25c   :  { %v443_v7 = vmax.f32 %v440_v5, 0.0 }
 0x25e   :  { %v444_v8 = vpack.c.bf16 %v443_v7, %v442_v6 }
 0x260   :  { %521 = vmatmul.bf16.vlgmr.msrb.gmra.mxu0 %v444_v8 }
 0x2dd   :  { %v522_v17 = vpop.f32.mrf.mxu0 }
 0x2de   :  { %v523_v19 = vadd.f32 %v1010_v18, %v522_v17 }
 0x2e0   :  { %v527_v22 = vmax.f32 %v523_v19, 0.0 }
 0x2e5   :  { %v524_v20 = vpop.f32.mrf.mxu0 }
 0x2e6   :  { %v525_v21 = vadd.f32 %v1010_v18, %v524_v20 }
 0x2e8   :  { %v528_v23 = vmax.f32 %v525_v21, 0.0 }
 0x2ea   :  { %v529_v24 = vpack.c.bf16 %v528_v23, %v527_v22 }
 0x2ec   :  { %606 = vmatmul.bf16.vlgmr.msrb.gmra.mxu1 %v529_v24 }
 0x369   :  { %v607_v29 = vpop.f32.mrf.mxu1 }
 0x36a   :  { %v608_v31 = vadd.f32 %v1011_v30, %v607_v29 }
 0x36c   :  { %v612_v34 = vmax.f32 %v608_v31, 0.0 }
 0x371   :  { %v609_v32 = vpop.f32.mrf.mxu1 }
 0x372   :  { %v610_v33 = vadd.f32 %v1011_v30, %v609_v32 }
 0x374   :  { %v613_v35 = vmax.f32 %v610_v33, 0.0 }
 0x376   :  { %v614_v36 = vpack.c.bf16 %v613_v35, %v612_v34 }
 0x378   :  { %691 = vmatmul.bf16.vlgmr.msrb.gmra.mxu2 %v614_v36 }
 0x3fb   :  { %v692_v38 = vpop.f32.mrf.mxu2 }
 0x3fc   :  { %v693_v39 = vadd.f32 %v1012_v37, %v692_v38 }
 0x3fe   :  { %v698_v40 = vsel %vm697_vm1, %v693_v39, -inf }
 0x3ff   :  { %699 = vmax.xlane.f32.xlu0 %v698_v40 }
 0x403   :  { %v694_v41 = vpop.f32.mrf.mxu2 }
 0x404   :  { %v695_v42 = vadd.f32 %v1012_v37, %v694_v41 }
 0x406   :  { %v701_v43 = vsel %vm697_vm1, %v695_v42, -inf }
 0x407   :  { %702 = vmax.xlane.f32.xlu0 %v701_v43 }
 0x472   :  { %v700_v44 = vpop.xlane.xlu0 %699 }
 0x473   :  { %v704_v45 = vsub.f32 %v693_v39, %v700_v44 }
 0x475   :  { %v706_v46 = vmul.f32 1.442695, %v704_v45 }
 0x477   :  { %1013 = vpow2.f32 %v706_v46 }
 0x47a   :  { %v703_v47 = vpop.xlane.xlu0 %702 }
 0x47b   :  { %v705_v48 = vsub.f32 %v695_v42, %v703_v47 }
 0x47d   :  { %v1014_v49 = vpop.eup %1013  ;;  %v708_v50 = vmul.f32 1.442695, %v705_v48 }
 0x47e   :  { %v710_v51 = vsel %vm697_vm1, %v1014_v49, 0.0 }
 0x47f   :  { %1015 = vpow2.f32 %v708_v50  ;;  %711 = vadd.xlane.f32.xlu1 %v710_v51 }
 0x485   :  { %v1016_v52 = vpop.eup %1015 }
 0x486   :  { %v713_v53 = vsel %vm697_vm1, %v1016_v52, 0.0 }
 0x487   :  { %714 = vadd.xlane.f32.xlu1 %v713_v53 }
 0x4f2   :  { %v712_v54 = vpop.xlane.xlu1 %711 }
 0x4f3   :  { %1017 = vrcp.f32 %v712_v54 }
 0x4f9   :  { %v1018_v55 = vpop.eup %1017 }
 0x4fa   :  { %v718_v56 = vmul.f32 %v1018_v55, %v1014_v49  ;;  %v715_v57 = vpop.xlane.xlu1 %714 }
 0x4fb   :  { %1019 = vrcp.f32 %v715_v57 }
 0x4fc   :  { %720 = vst.msk [vmem:[#allocation13] sm:$0xff] %vm697_vm1, %v718_v56 }
 0x501   :  { %v1020_v58 = vpop.eup %1019 }
 0x502   :  { %v719_v59 = vmul.f32 %v1020_v58, %v1016_v52 }
 0x504   :  { %721 = vst.msk [vmem:[#allocation13 + $0x8] sm:$0xff] %vm697_vm1, %v719_v59 }
 0x505   :  { %734 = dma.vmem_to_hbm [thread:$0]  %s727_s13, 256, %s729_s6, [#allocation4], %s1204_s21, %s1204_s21, %s1205_s22  }
 0x506   :  { %1197 = dma.done.wait [#allocation4], 256  }
 0x507   :  { %1198 = vsyncadd [#allocation4], 4294967040 }
 0x508   :  { %739 = vsyncpa [#allocation3], 1 }
 0x509   :  { %740 = vsyncpa [#allocation6], 1 }
 0x50a   :  { %741 = vsyncpa [#allocation9], 1 }
 0x50b   :  { %742 = vsyncpa [#allocation12], 1 }
 0x50c   :  { %743 = vsyncpa [#allocation4], 1 }

</bundles_post_ra>
